<compile_context>
chip_gen: v6e
topology: v6e:2x2x1
jax: 0.10.0
libtpu: 0.0.40
codegen_flags: <defaults>
</compile_context>

<pallas_src>
import functools
import math

import jax
import jax.numpy as jnp
from jax.experimental import pallas as pl
from jax.experimental.pallas import tpu as pltpu

TEMPERATURE = 0.07
EPS_NCE = 1e-7
EPS_NORM = 1e-12


def _pick_tile(dim, pref, align):
    """Largest tile <= pref that divides `dim` and is a multiple of `align`;
    falls back to the full dim (full-dim blocks are always legal for BlockSpec)."""
    if dim <= pref:
        return dim
    t = pref
    while t >= align:
        if dim % t == 0:
            return t
        t //= 2
    return dim


# --------------------------------------------------------------------------------------
# Kernel 1: similarity scores for all directions (equivalent of compute_scores: bmm/T)
# --------------------------------------------------------------------------------------
def _score_kernel(d2c_ref, d2b_ref, ctx_ref, pos_ref, neg_ref,
                  pos_out_ref, neg_out_ref, *, tn):
    # d2c_ref / d2b_ref: scalar-prefetch lookup tables, consumed only by the index_maps.
    del d2c_ref, d2b_ref
    # ctx_ref: (1, TN, D) f32   L2-normalized context, pre-scaled by 1/T
    # pos_ref: (1, TN, D) bank dtype (bf16)
    # neg_ref: (1, TN, TK, D) bank dtype (bf16)
    ctx = ctx_ref[0]                                   # (TN, D) f32
    ctx_lp = ctx.astype(neg_ref.dtype)                 # bf16 operand for the MXU

    # Per-row contraction over D on the MXU: score[r, :] = ctx[r] @ neg[r].T
    # TN is small (<= 8) -> static unroll of plain 2-D matmuls with f32 accumulation.
    for r in range(tn):
        neg_out_ref[0, r:r + 1, :] = jax.lax.dot_general(
            ctx_lp[r:r + 1, :], neg_ref[0, r],
            dimension_numbers=(((1,), (1,)), ((), ())),   # contract D; rhs used transposed
            preferred_element_type=jnp.float32)

    # Positive score (tiny: TN x D) only on the first K step; post-MXU math stays f32.
    @pl.when(pl.program_id(2) == 0)
    def _():
        pos_out_ref[0] = jnp.sum(pos_ref[0].astype(jnp.float32) * ctx,
                                 axis=-1, keepdims=True)


def compute_scores(ctx_stack, pos_rows, neg_rows, dir2ctx, dir2bank):
    """ctx_stack: (2, N, D) f32 (normalized * 1/T); pos_rows: (2, N, D); neg_rows: (2, N, K, D).
       dir2ctx / dir2bank: (S,) int32 tables mapping direction -> ctx row / bank row.
       Returns pos_scores (S, N, 1) f32 and neg_scores (S, N, K) f32 (already divided by T)."""
    _, n, d = ctx_stack.shape
    k = neg_rows.shape[2]
    s = dir2ctx.shape[0]
    tn = _pick_tile(n, 8, 8)         # small N tile: kernel unrolls per-row MXU dots
    tk = _pick_tile(k, 2048, 128)    # K tile sized for ~8 MiB of double-buffered negatives

    grid_spec = pltpu.PrefetchScalarGridSpec(
        num_scalar_prefetch=2,
        grid=(s, n // tn, k // tk),
        in_specs=[
            pl.BlockSpec((1, tn, d), lambda si, i, j, d2c, d2b: (d2c[si], i, 0)),       # ctx
            pl.BlockSpec((1, tn, d), lambda si, i, j, d2c, d2b: (d2b[si], i, 0)),       # pos
            pl.BlockSpec((1, tn, tk, d), lambda si, i, j, d2c, d2b: (d2b[si], i, j, 0)),  # neg
        ],
        out_specs=(
            pl.BlockSpec((1, tn, 1), lambda si, i, j, d2c, d2b: (si, i, 0)),
            pl.BlockSpec((1, tn, tk), lambda si, i, j, d2c, d2b: (si, i, j)),
        ),
    )
    return pl.pallas_call(
        functools.partial(_score_kernel, tn=tn),
        out_shape=(jax.ShapeDtypeStruct((s, n, 1), jnp.float32),
                   jax.ShapeDtypeStruct((s, n, k), jnp.float32)),
        grid_spec=grid_spec,
        compiler_params=pltpu.CompilerParams(
            dimension_semantics=("parallel", "parallel", "arbitrary")),
    )(dir2ctx, dir2bank, ctx_stack, pos_rows, neg_rows)


# --------------------------------------------------------------------------------------
# Kernel 2: NCE loss for all directions, given scores and log(Z)
# --------------------------------------------------------------------------------------
def _nce_kernel(logz_ref, pos_ref, neg_ref, loss_ref, *, k_pn, inv_n, neg_count):
    # logz_ref: SMEM (1,) f32.   pos_ref: (S, TN, 1) f32.   neg_ref: (S, TN, K) f32.
    # loss_ref: (S, 1, 1) f32 -- resident accumulator across the N-tile grid axis.
    @pl.when(pl.program_id(0) == 0)
    def _():
        loss_ref[...] = jnp.zeros_like(loss_ref)

    logz = logz_ref[0]
    c = jnp.float32(k_pn + EPS_NCE)
    pos = pos_ref[...]
    neg = neg_ref[...]
    # positive term: log(P_pos / (P_pos + K*Pn + eps)),  P_pos = exp(pos - logZ)
    pos_term = (pos - logz) - jnp.log(jnp.exp(pos - logz) + c)               # (S, TN, 1)
    pos_sum = jnp.sum(pos_term, axis=1, keepdims=True)                       # (S, 1, 1)
    # negative term: sum_k log(K*Pn / (P_neg + K*Pn + eps))
    neg_logsum = jnp.sum(jnp.sum(jnp.log(jnp.exp(neg - logz) + c),
                                 axis=2, keepdims=True),
                         axis=1, keepdims=True)                              # (S, 1, 1)
    per_dir = pos_sum + jnp.float32(neg_count * math.log(k_pn)) - neg_logsum
    loss_ref[...] += jnp.float32(-inv_n) * per_dir


def nce_losses(pos_scores, neg_scores, log_z, num_data):
    s, n, k = neg_scores.shape
    tn = _pick_tile(n, 128, 8)
    kern = functools.partial(
        _nce_kernel,
        k_pn=float(k) / float(num_data),
        inv_n=1.0 / float(n),
        neg_count=float(tn) * float(k))
    out = pl.pallas_call(
        kern,
        out_shape=jax.ShapeDtypeStruct((s, 1, 1), jnp.float32),
        grid=(n // tn,),
        in_specs=[
            pl.BlockSpec(memory_space=pltpu.MemorySpace.SMEM),         # log(Z) scalar
            pl.BlockSpec((s, tn, 1), lambda i: (0, i, 0)),
            pl.BlockSpec((s, tn, k), lambda i: (0, i, 0)),
        ],
        out_specs=pl.BlockSpec((s, 1, 1), lambda i: (0, 0, 0)),
        compiler_params=pltpu.CompilerParams(dimension_semantics=("arbitrary",)),
    )(log_z, pos_scores, neg_scores)
    return out.reshape(s)


# --------------------------------------------------------------------------------------
# AVID module (functional JAX port; memory banks held as arrays, updated out-of-place)
# --------------------------------------------------------------------------------------
def _l2_normalize(x, axis=-1):
    nrm = jnp.sqrt(jnp.sum(x * x, axis=axis, keepdims=True))
    return x / jnp.maximum(nrm, EPS_NORM)


class AVID:
    def __init__(self, num_data, embedding_dim, num_negatives=4096, momentum=0.9,
                 xModal_coeff=1.0, wModal_coeff=0.0, seed=0, mem_dtype=jnp.bfloat16):
        self.num_data = num_data
        self.embedding_dim = embedding_dim
        self.num_negatives = num_negatives
        if not isinstance(momentum, (list, tuple)):
            momentum = [momentum] * 2
        self.momentum = list(momentum)
        sum_coeff = xModal_coeff + wModal_coeff
        self.xModal_coeff = xModal_coeff / sum_coeff
        self.wModal_coeff = wModal_coeff / sum_coeff
        self.xModal = xModal_coeff > 0.0
        self.wModal = wModal_coeff > 0.0

        # Memory banks: randn rows, L2-normalized, stacked (row 0 = view1/video, 1 = view2/audio),
        # stored in bf16 (halves HBM traffic of the dominant negative-row reads).
        k1, k2 = jax.random.split(jax.random.PRNGKey(seed))
        m0 = _l2_normalize(jax.random.normal(k1, (num_data, embedding_dim), jnp.float32))
        m1 = _l2_normalize(jax.random.normal(k2, (num_data, embedding_dim), jnp.float32))
        self.mem = jnp.stack([m0, m1]).astype(mem_dtype)     # (2, num_data, D)

        # Direction tables: (name, ctx index [0=video,1=audio], bank index [0=view1,1=view2])
        dirs = []
        if self.xModal:
            dirs += [("v2a", 0, 1), ("a2v", 1, 0)]
        if self.wModal:
            dirs += [("v2v", 0, 0), ("a2a", 1, 1)]
        self.dirs = dirs
        self.dir2ctx = jnp.array([d[1] for d in dirs], jnp.int32)
        self.dir2bank = jnp.array([d[2] for d in dirs], jnp.int32)

        # NCECriterion partition-function buffer (avg_exp_score), estimated on first batch.
        # NOTE: Python-level check -> intended for eager use (would be a trace-time side
        # effect if the whole forward were jitted before the first real batch).
        self.avg_exp_score = None

        # TODO(synk): torch.distributed broadcast/gather paths are single-device no-ops here.

    # ---------------- negative sampling ----------------
    def _sample_negatives(self, y, K, key):
        # AliasMethod over ones(memory_size-1) == uniform over [0, num_data-2],
        # shifted past the positive index (matches the torch sampler semantics).
        bs = y.shape[0]
        idx = jax.random.randint(key, (bs, K), 0, self.num_data - 1, dtype=jnp.int32)
        idx = idx + (idx >= y[:, None]).astype(jnp.int32)
        return idx

    # ---------------- forward ----------------
    def forward(self, emb1, emb2, target, sample_key):
        K = self.num_negatives
        y = target.astype(jnp.int32)

        # L2-normalize each modality ONCE and fold 1/T into the context vectors
        # (reused for every score direction and for the memory-bank EMA update).
        v_norm = _l2_normalize(emb1.astype(jnp.float32))
        a_norm = _l2_normalize(emb2.astype(jnp.float32))
        ctx_stack = jnp.stack([v_norm, a_norm]) * jnp.float32(1.0 / TEMPERATURE)  # (2, N, D)

        # Gather positive / negative memory rows from both banks at once (bf16).
        idx = self._sample_negatives(y, K, sample_key)
        pos_rows = self.mem[:, y]        # (2, N, D)
        neg_rows = self.mem[:, idx]      # (2, N, K, D)
        # TODO(synk): fuse this negative gather into the score kernel (scalar-prefetched idx +
        # per-row DMA from the bank held in pl.ANY) to avoid materializing (2,N,K,D) in HBM.

        pos_scores, neg_scores = compute_scores(
            ctx_stack, pos_rows, neg_rows, self.dir2ctx, self.dir2bank)
        # pos_scores: (S, N, 1), neg_scores: (S, N, K) -- already divided by T via ctx pre-scale.

        # Memory bank EMA update (uses the normalized embeddings, like the torch code).
        emb_norm = jnp.stack([v_norm, a_norm])                        # (2, N, D)
        mom = jnp.array(self.momentum, jnp.float32)[:, None, None]    # (2, 1, 1)
        old = self.mem[:, y].astype(jnp.float32)
        upd = _l2_normalize(old * mom + emb_norm * (1.0 - mom))
        self.mem = self.mem.at[:, y].set(upd.astype(self.mem.dtype))

        # NCE partition function: estimated once from the first direction's negative scores.
        if self.avg_exp_score is None:
            self.avg_exp_score = jnp.mean(jnp.exp(neg_scores[0]))
        log_z = jnp.log(self.avg_exp_score * self.num_data).reshape(1).astype(jnp.float32)

        losses = nce_losses(pos_scores, neg_scores, log_z, self.num_data)   # (S,)

        # Aggregate like the torch module.
        tb_log = {}
        xModal_loss, wModal_loss = 0.0, 0.0
        for si, (name, _, _) in enumerate(self.dirs):
            loss = losses[si]
            if name in ("v2a", "a2v"):
                xModal_loss = xModal_loss + loss / 2.0
            else:
                wModal_loss = wModal_loss + loss / 2.0
            tb_log[f"Loss/{name}"] = loss
        tb_log["Loss/xModal"] = xModal_loss
        tb_log["Loss/wModal"] = wModal_loss
        total_loss = xModal_loss * self.xModal_coeff + wModal_loss * self.wModal_coeff
        return total_loss, tb_log


# --------------------------------------------------------------------------------------
if __name__ == "__main__":
    num_data = 64          # training-set size (memory bank rows)
    embedding_dim = 32
    num_negatives = 16
    batch = 4

    model = AVID(num_data=num_data, embedding_dim=embedding_dim,
                 num_negatives=num_negatives, momentum=0.9,
                 xModal_coeff=1.0, wModal_coeff=0.0, seed=0)

    key = jax.random.PRNGKey(0)
    k1, k2, k3, k4 = jax.random.split(key, 4)
    emb1 = jax.random.normal(k1, (batch, embedding_dim), jnp.float32)   # video embeddings
    emb2 = jax.random.normal(k2, (batch, embedding_dim), jnp.float32)   # audio embeddings
    target = jax.random.permutation(k3, num_data)[:batch].astype(jnp.int32)

    total_loss, tb_log = model.forward(emb1, emb2, target, sample_key=k4)
    jax.block_until_ready(total_loss)
    print("KERNEL_OK")
</pallas_src>

<mosaic_0001>
module attributes {stable_mosaic.version = 11 : i64} {
  func.func @_score_kernel(%arg0: i32, %arg1: i32, %arg2: i32, %arg3: memref<2xi32, #tpu.memory_space<smem>>, %arg4: memref<2xi32, #tpu.memory_space<smem>>, %arg5: memref<1x4x32xf32, #tpu.memory_space<vmem>>, %arg6: memref<1x4x32xbf16, #tpu.memory_space<vmem>>, %arg7: memref<1x4x16x32xbf16, #tpu.memory_space<vmem>>, %arg8: memref<1x4x1xf32, #tpu.memory_space<vmem>>, %arg9: memref<1x4x16xf32, #tpu.memory_space<vmem>>) attributes {dimension_semantics = [#tpu.dimension_semantics<parallel>, #tpu.dimension_semantics<parallel>, #tpu.dimension_semantics<arbitrary>], iteration_bounds = array<i64: 2, 1, 1>, scalar_prefetch = 2 : i64, scratch_operands = 0 : i64, tpu.core_type = #tpu.core_type<tc>, window_params = [{transform_indices = @transform_0, window_bounds = array<i64: 1, 4, 32>}, {transform_indices = @transform_1, window_bounds = array<i64: 1, 4, 32>}, {transform_indices = @transform_2, window_bounds = array<i64: 1, 4, 16, 32>}, {transform_indices = @transform_3, window_bounds = array<i64: 1, 4, 1>}, {transform_indices = @transform_4, window_bounds = array<i64: 1, 4, 16>}]} {
    %c0 = arith.constant 0 : index
    %c0_0 = arith.constant 0 : index
    %c0_1 = arith.constant 0 : index
    %0 = vector.load %arg5[%c0, %c0_0, %c0_1] : memref<1x4x32xf32, #tpu.memory_space<vmem>>, vector<1x4x32xf32>
    %1 = vector.shape_cast %0 : vector<1x4x32xf32> to vector<4x32xf32>
    %2 = arith.truncf %1 : vector<4x32xf32> to vector<4x32xbf16>
    %3 = vector.extract_strided_slice %2 {offsets = [0, 0], sizes = [1, 32], strides = [1, 1]} : vector<4x32xbf16> to vector<1x32xbf16>
    %c0_2 = arith.constant 0 : index
    %c0_3 = arith.constant 0 : index
    %c0_4 = arith.constant 0 : index
    %c0_5 = arith.constant 0 : index
    %4 = vector.load %arg7[%c0_2, %c0_3, %c0_4, %c0_5] : memref<1x4x16x32xbf16, #tpu.memory_space<vmem>>, vector<1x1x16x32xbf16>
    %5 = vector.shape_cast %4 : vector<1x1x16x32xbf16> to vector<16x32xbf16>
    %cst = arith.constant dense<0.000000e+00> : vector<1x16xf32>
    %6 = tpu.matmul %3, %5, %cst {dimension_numbers = #tpu.dot_dimension_numbers<[1], [1], [0], [0], [0, 0, 1, 0], [], []>} : vector<1x32xbf16>, vector<16x32xbf16>, vector<1x16xf32> -> vector<1x16xf32>
    %c0_6 = arith.constant 0 : index
    %c0_7 = arith.constant 0 : index
    %c0_8 = arith.constant 0 : index
    %7 = vector.load %arg9[%c0_6, %c0_7, %c0_8] : memref<1x4x16xf32, #tpu.memory_space<vmem>>, vector<1x1x16xf32>
    %8 = vector.shape_cast %7 : vector<1x1x16xf32> to vector<1x16xf32>
    %9 = vector.shape_cast %6 : vector<1x16xf32> to vector<1x1x16xf32>
    tpu.vector_store %arg9[%c0_6, %c0_7, %c0_8], %9 {strides = array<i32>} : memref<1x4x16xf32, #tpu.memory_space<vmem>>, vector<1x1x16xf32>,
    %10 = vector.extract_strided_slice %2 {offsets = [1, 0], sizes = [1, 32], strides = [1, 1]} : vector<4x32xbf16> to vector<1x32xbf16>
    %c0_9 = arith.constant 0 : index
    %c1 = arith.constant 1 : index
    %c0_10 = arith.constant 0 : index
    %c0_11 = arith.constant 0 : index
    %11 = vector.load %arg7[%c0_9, %c1, %c0_10, %c0_11] : memref<1x4x16x32xbf16, #tpu.memory_space<vmem>>, vector<1x1x16x32xbf16>
    %12 = vector.shape_cast %11 : vector<1x1x16x32xbf16> to vector<16x32xbf16>
    %cst_12 = arith.constant dense<0.000000e+00> : vector<1x16xf32>
    %13 = tpu.matmul %10, %12, %cst_12 {dimension_numbers = #tpu.dot_dimension_numbers<[1], [1], [0], [0], [0, 0, 1, 0], [], []>} : vector<1x32xbf16>, vector<16x32xbf16>, vector<1x16xf32> -> vector<1x16xf32>
    %c0_13 = arith.constant 0 : index
    %c1_14 = arith.constant 1 : index
    %c0_15 = arith.constant 0 : index
    %14 = vector.load %arg9[%c0_13, %c1_14, %c0_15] : memref<1x4x16xf32, #tpu.memory_space<vmem>>, vector<1x1x16xf32>
    %15 = vector.shape_cast %14 : vector<1x1x16xf32> to vector<1x16xf32>
    %16 = vector.shape_cast %13 : vector<1x16xf32> to vector<1x1x16xf32>
    tpu.vector_store %arg9[%c0_13, %c1_14, %c0_15], %16 {strides = array<i32>} : memref<1x4x16xf32, #tpu.memory_space<vmem>>, vector<1x1x16xf32>,
    %17 = vector.extract_strided_slice %2 {offsets = [2, 0], sizes = [1, 32], strides = [1, 1]} : vector<4x32xbf16> to vector<1x32xbf16>
    %c0_16 = arith.constant 0 : index
    %c2 = arith.constant 2 : index
    %c0_17 = arith.constant 0 : index
    %c0_18 = arith.constant 0 : index
    %18 = vector.load %arg7[%c0_16, %c2, %c0_17, %c0_18] : memref<1x4x16x32xbf16, #tpu.memory_space<vmem>>, vector<1x1x16x32xbf16>
    %19 = vector.shape_cast %18 : vector<1x1x16x32xbf16> to vector<16x32xbf16>
    %cst_19 = arith.constant dense<0.000000e+00> : vector<1x16xf32>
    %20 = tpu.matmul %17, %19, %cst_19 {dimension_numbers = #tpu.dot_dimension_numbers<[1], [1], [0], [0], [0, 0, 1, 0], [], []>} : vector<1x32xbf16>, vector<16x32xbf16>, vector<1x16xf32> -> vector<1x16xf32>
    %c0_20 = arith.constant 0 : index
    %c2_21 = arith.constant 2 : index
    %c0_22 = arith.constant 0 : index
    %21 = vector.load %arg9[%c0_20, %c2_21, %c0_22] : memref<1x4x16xf32, #tpu.memory_space<vmem>>, vector<1x1x16xf32>
    %22 = vector.shape_cast %21 : vector<1x1x16xf32> to vector<1x16xf32>
    %23 = vector.shape_cast %20 : vector<1x16xf32> to vector<1x1x16xf32>
    tpu.vector_store %arg9[%c0_20, %c2_21, %c0_22], %23 {strides = array<i32>} : memref<1x4x16xf32, #tpu.memory_space<vmem>>, vector<1x1x16xf32>,
    %24 = vector.extract_strided_slice %2 {offsets = [3, 0], sizes = [1, 32], strides = [1, 1]} : vector<4x32xbf16> to vector<1x32xbf16>
    %c0_23 = arith.constant 0 : index
    %c3 = arith.constant 3 : index
    %c0_24 = arith.constant 0 : index
    %c0_25 = arith.constant 0 : index
    %25 = vector.load %arg7[%c0_23, %c3, %c0_24, %c0_25] : memref<1x4x16x32xbf16, #tpu.memory_space<vmem>>, vector<1x1x16x32xbf16>
    %26 = vector.shape_cast %25 : vector<1x1x16x32xbf16> to vector<16x32xbf16>
    %cst_26 = arith.constant dense<0.000000e+00> : vector<1x16xf32>
    %27 = tpu.matmul %24, %26, %cst_26 {dimension_numbers = #tpu.dot_dimension_numbers<[1], [1], [0], [0], [0, 0, 1, 0], [], []>} : vector<1x32xbf16>, vector<16x32xbf16>, vector<1x16xf32> -> vector<1x16xf32>
    %c0_27 = arith.constant 0 : index
    %c3_28 = arith.constant 3 : index
    %c0_29 = arith.constant 0 : index
    %28 = vector.load %arg9[%c0_27, %c3_28, %c0_29] : memref<1x4x16xf32, #tpu.memory_space<vmem>>, vector<1x1x16xf32>
    %29 = vector.shape_cast %28 : vector<1x1x16xf32> to vector<1x16xf32>
    %30 = vector.shape_cast %27 : vector<1x16xf32> to vector<1x1x16xf32>
    tpu.vector_store %arg9[%c0_27, %c3_28, %c0_29], %30 {strides = array<i32>} : memref<1x4x16xf32, #tpu.memory_space<vmem>>, vector<1x1x16xf32>,
    %c0_i32 = arith.constant 0 : i32
    %31 = arith.cmpi eq, %arg2, %c0_i32 : i32
    %32 = arith.extui %31 : i1 to i32
    %c0_i32_30 = arith.constant 0 : i32
    %33 = arith.cmpi ne, %32, %c0_i32_30 : i32
    scf.if %33 {
      %c0_31 = arith.constant 0 : index
      %c0_32 = arith.constant 0 : index
      %c0_33 = arith.constant 0 : index
      %34 = vector.load %arg6[%c0_31, %c0_32, %c0_33] : memref<1x4x32xbf16, #tpu.memory_space<vmem>>, vector<1x4x32xbf16>
      %35 = vector.shape_cast %34 : vector<1x4x32xbf16> to vector<4x32xbf16>
      %36 = arith.extf %35 : vector<4x32xbf16> to vector<4x32xf32>
      %37 = arith.mulf %36, %1 : vector<4x32xf32>
      %cst_34 = arith.constant dense<0.000000e+00> : vector<4xf32>
      %38 = vector.multi_reduction <add>, %37, %cst_34 [1] : vector<4x32xf32> to vector<4xf32>
      %39 = vector.shape_cast %38 : vector<4xf32> to vector<4x1xf32>
      %c0_35 = arith.constant 0 : index
      %c0_36 = arith.constant 0 : index
      %c0_37 = arith.constant 0 : index
      %40 = vector.load %arg8[%c0_35, %c0_36, %c0_37] : memref<1x4x1xf32, #tpu.memory_space<vmem>>, vector<1x4x1xf32>
      %41 = vector.shape_cast %40 : vector<1x4x1xf32> to vector<4x1xf32>
      %42 = vector.shape_cast %39 : vector<4x1xf32> to vector<1x4x1xf32>
      tpu.vector_store %arg8[%c0_35, %c0_36, %c0_37], %42 {strides = array<i32>} : memref<1x4x1xf32, #tpu.memory_space<vmem>>, vector<1x4x1xf32>,
    } else {
    }
    return
  }
  func.func @transform_0(%arg0: i32, %arg1: i32, %arg2: i32, %arg3: memref<2xi32, #tpu.memory_space<smem>>, %arg4: memref<2xi32, #tpu.memory_space<smem>>) -> (i32, i32, i32) {
    %0 = arith.index_cast %arg0 : i32 to index
    %1 = memref.load %arg3[%0] : memref<2xi32, #tpu.memory_space<smem>>
    %c0_i32 = arith.constant 0 : i32
    %c0_i32_0 = arith.constant 0 : i32
    return %1, %arg1, %c0_i32 : i32, i32, i32
  }
  func.func @transform_1(%arg0: i32, %arg1: i32, %arg2: i32, %arg3: memref<2xi32, #tpu.memory_space<smem>>, %arg4: memref<2xi32, #tpu.memory_space<smem>>) -> (i32, i32, i32) {
    %0 = arith.index_cast %arg0 : i32 to index
    %1 = memref.load %arg4[%0] : memref<2xi32, #tpu.memory_space<smem>>
    %c0_i32 = arith.constant 0 : i32
    %c0_i32_0 = arith.constant 0 : i32
    return %1, %arg1, %c0_i32 : i32, i32, i32
  }
  func.func @transform_2(%arg0: i32, %arg1: i32, %arg2: i32, %arg3: memref<2xi32, #tpu.memory_space<smem>>, %arg4: memref<2xi32, #tpu.memory_space<smem>>) -> (i32, i32, i32, i32) {
    %0 = arith.index_cast %arg0 : i32 to index
    %1 = memref.load %arg4[%0] : memref<2xi32, #tpu.memory_space<smem>>
    %c0_i32 = arith.constant 0 : i32
    %c0_i32_0 = arith.constant 0 : i32
    return %1, %arg1, %arg2, %c0_i32 : i32, i32, i32, i32
  }
  func.func @transform_3(%arg0: i32, %arg1: i32, %arg2: i32, %arg3: memref<2xi32, #tpu.memory_space<smem>>, %arg4: memref<2xi32, #tpu.memory_space<smem>>) -> (i32, i32, i32) {
    %c0_i32 = arith.constant 0 : i32
    %c0_i32_0 = arith.constant 0 : i32
    return %arg0, %arg1, %c0_i32 : i32, i32, i32
  }
  func.func @transform_4(%arg0: i32, %arg1: i32, %arg2: i32, %arg3: memref<2xi32, #tpu.memory_space<smem>>, %arg4: memref<2xi32, #tpu.memory_space<smem>>) -> (i32, i32, i32) {
    %c0_i32 = arith.constant 0 : i32
    return %arg0, %arg1, %arg2 : i32, i32, i32
  }
}

</mosaic_0001>

<bundles_post_ra>
// kernel: tpu_custom_call.1
= control target key start
LH: loop header
LB: loop body
LE: loop exit
PB: predicated region body
PF: predicated region fallthrough
CT: control target
= control target key end

     0   :  { %s1199_s21 = smov [#allocation3]   ;;  %s1575_s0 = inlined_call_operand.hbm [shape: s32[2], index: 0, kind: input, shape index: {}]   ;;  %s1576_s2 = inlined_call_operand.hbm [shape: f32[2,4,32], index: 2, kind: input, shape index: {}]   ;;  %s1577_s3 = inlined_call_operand.vmem [shape: bf16[2,4,32], index: 3, kind: input, shape index: {}]   ;;  %s1578_s4 = inlined_call_operand.hbm [shape: bf16[2,4,16,32], index: 4, kind: input, shape index: {}]   ;;  %s1579_s5 = inlined_call_operand.vmem [shape: f32[2,4,1], index: 5, kind: output, shape index: {0}]   ;;  %s1580_s6 = inlined_call_operand.hbm [shape: f32[2,4,16], index: 6, kind: output, shape index: {1}]   ;;  %s1581_s1 = inlined_call_operand.vmem [shape: s32[2], index: 1, kind: input, shape index: {}]  }
   0x1   :  { %1596 = sst [smem:[#allocation27_spill]] %s1579_s5  ;;  %s14_s26 = sshll.u32 %s1581_s1, 4  ;;  %s15_s26 = int_to_ptr.vmem [resolvable:$true] %s14_s26 }
   0x2   :  { %1597 = sst [smem:[#allocation28_spill]] %s1580_s6  ;;  %s995_s27 = scalar_lea.vmem %s15_s26, 16 }
   0x3   :  { %13 = dma.hbm_to_smem %s1575_s0, 16, %s1199_s21, [#allocation2] }
   0x4   :  { %p996_p0 = scmp.ne.s32.totalorder %s15_s26, %s995_s27  ;;  %p1000_p1 = scmp.lt.s32.totalorder %s15_s26, %s15_s26 }
   0x5   :  { %p1001_p2 = scmp.lt.s32.totalorder %s995_s27, %s995_s27 }
   0x7   :  { %p1002_p3 = por %p1001_p2, %p1000_p1 }
   0x9   :  { %p1003_p4 = pnand %p1002_p3, %p996_p0 }
   0xb   :  { %1006 = shalt.err (!%p1003_p4)  }
   0xc   :  { %s1200_s28 = smov [#allocation4]  }
   0xd   :  { %17 = dma.vmem_to_smem %s15_s26, 16, %s1200_s28, [#allocation2] }
   0xe   :  { %1137 = dma.done.wait [#allocation2], 32 }
   0xf   :  { %1138 = vsyncadd [#allocation2], 4294967264 }
  0x10   :  { %19 = sfence }
  0x11   :  { %20 = vsyncpa [#allocation6], 0 }
  0x12   :  { %22 = vsyncpa [#allocation6 + $0x1], 0 }
  0x13   :  { %23 = vsyncpa [#allocation9], 0 }
  0x14   :  { %25 = vsyncpa [#allocation9 + $0x1], 0 }
  0x15   :  { %26 = vsyncpa [#allocation7], 0 }
  0x16   :  { %28 = vsyncpa [#allocation7 + $0x1], 0  ;;  %s1249_s0 = smov 0   ;;  %s1251_s1 = smov 0  }
  0x17   :  { %s1253_s29 = smov 0   ;;  %s1255_s30 = smov 0  }
  0x18   :  { %s1257_s7 = smov 0   ;;  %s1259_s8 = smov 0  }
  0x19   :  { %s1261_s9 = smov 0   ;;  %s1263_s10 = smov 0  }
  0x1a   :  { %s1265_s11 = smov 0   ;;  %s1267_s12 = smov 0  }
  0x1b   :  { %s1269_s13 = smov 0   ;;  %s1271_s14 = smov 0  }
  0x1c LB: > { %1598 = sst [smem:[#allocation19_spill]] %s1153_s0  ;;  %s788_s15 = sadd.s32 4294967295, %s1197_s14   ;;  %s1197_s14 = sphi %s1271_s14, %s34_s14   ;;  %s1193_s13 = sphi %s1269_s13, %s1645_s13   ;;  %s1189_s12 = sphi %s1267_s12, %s1644_s12   ;;  %s1185_s11 = sphi %s1265_s11, %s1635_s11   ;;  %s1181_s10 = sphi %s1263_s10, %s1643_s10   ;;  %s1177_s9 = sphi %s1261_s9, %s1642_s9   ;;  %s1173_s8 = sphi %s1259_s8, %s1641_s8   ;;  %s1169_s7 = sphi %s1257_s7, %s1640_s7   ;;  %s1165_s30 = sphi %s1255_s30, %s1639_s30   ;;  %s1161_s29 = sphi %s1253_s29, %s1633_s29   ;;  %s1157_s1 = sphi %s1251_s1, %s1638_s1   ;;  %s1153_s0 = sphi %s1249_s0, %s1637_s0  }
  0x1d   : > { %1599 = sst [smem:[#allocation20_spill]] %s1161_s29  ;;  %s789_s16 = sadd.s32 4294967294, %s1197_s14  }
  0x1e   : > { %1600 = sst [smem:[#allocation21_spill]] %s1185_s11  ;;  %s53_s17 = sadd.s32 1, %s1193_s13 }
  0x1f   : > { %p55_p5 = scmp.ge.s32.totalorder %s53_s17, 2  ;;  %s57_s18 = sld [smem:[#allocation3 + %s1193_s13]] }
  0x20   : > { %p71_p6 = scmp.ne.s32.totalorder %s1185_s11, %s1181_s10  ;;  %p1591_p7 = scmp.eq.s32.totalorder %s1197_s14, 0 }
  0x21   : > { %s1647_s17 = smov (%p55_p5, %s53_s17), 0  ;;  %s64_s19 = sadd.s32 1, %s1185_s11 }
  0x22   : > { %1601 = sst [smem:[#allocation22_spill]] %s1647_s17  ;;  %p77_p8 = scmp.ne.s32.totalorder %s1181_s10, %s1177_s9 }
  0x23   : > { %s58_s20 = sld [smem:[#allocation3 + %s1647_s17]]  ;;  %p1319_p9 = scmp.eq.s32.totalorder %s788_s15, 0 }
  0x24   : > { %p1325_p10 = por %p1591_p7, %p71_p6  ;;  %s177_s23 = ssub.s32 %s1193_s13, %s1647_s17 }
  0x25   : > { %s1602_s21 = scalar_select %p1319_p9, 1, 0 }
  0x26   : > { %p1333_p11 = por %p1319_p9, %p77_p8  ;;  %p182_p12 = scmp.eq.s32.totalorder %s177_s23, 0 }
  0x27   : > { %s184_s25 = sadd.s32 1, %s1161_s29  ;;  %p194_p13 = scmp.ne.s32.totalorder %s1161_s29, %s1157_s1 }
  0x28   : > { %s1604_s24 = scalar_select %p1333_p11, 1, 0 }
  0x29   : > { %s1341_s26 = scalar_select %p182_p12, %s1161_s29, %s184_s25  }
  0x2a   : > { %p195_p0 = scmp.eq.s32.totalorder %s788_s15, 1  ;;  %p200_p1 = scmp.ne.s32.totalorder %s1157_s1, %s1153_s0 }
  0x2b   : > { %1605 = sst [smem:[#allocation23_spill]] %s1341_s26  ;;  %s59_s27 = ssub.s32 %s57_s18, %s58_s20 }
  0x2c   : > { %p201_p2 = scmp.eq.s32.totalorder %s789_s16, 1  ;;  %p62_p3 = scmp.eq.s32.totalorder %s59_s27, 0 }
  0x2d   : > { %p1345_p4 = por %p195_p0, %p194_p13  ;;  %p1590_p8 = scmp.lt.s32.totalorder %s1197_s14, 2 }
  0x2e   : > { %p1349_p5 = por %p201_p2, %p200_p1  ;;  %s221_s15 = sand.u32 1, %s1185_s11  }
  0x2f   : > { %s1606_s28 = scalar_select %p1345_p4, 1, 0 }
  0x30   : > { %s1608_s9 = scalar_select %p1349_p5, 1, 0 }
  0x31   : > { %1607 = sst [smem:[#allocation24_spill]] %s1606_s28  ;;  %s792_s16 = sshll.u32 %s221_s15, 2 }
  0x32   : > { %1609 = sst [smem:[#allocation25_spill]] %s1608_s9  ;;  %p1366_p12 = pnand %p1590_p8, %p1325_p10 }
  0x33   : > { %s1355_s23 = scalar_select %p62_p3, %s1185_s11, %s64_s19  }
  0x34   : > { %s1360_s25 = sld [smem:[#allocation4 + %s1193_s13]]  ;;  %p797_p13 = scmp.ge.s32.totalorder %s1197_s14, 1 }
  0x35   : > { %1610 = sst [smem:[#allocation26_spill]] %s1355_s23  ;;  %s225_s23 = scalar_lea.vmem [#allocation5], %s792_s16 }
  0x36   : > { %s854_s20 = scalar_select %p1325_p10, [#allocation3], [#allocation11] }
  0x37   : > { %s855_s27 = scalar_select %p1325_p10, %s1193_s13, 0 }
  0x38   : > { %s1649_s20 = smov (!%p1590_p8, %s854_s20), [#allocation13]  ;;  %s234_s11 = sshll.u32 %s225_s23, 4  ;;  %s1385_s11 = int_to_ptr.vmem [resolvable:$true] %s234_s11 }
  0x39   : > { %s1651_s27 = smov (!%p1590_p8, %s855_s27), 0  ;;  %p278_p0 = scmp.lt.s32.totalorder %s1197_s14, 3 }
  0x3a   : > { %s226_s19 = sld [smem:[%s1649_s20 + %s1651_s27]]  ;;  %s222_s28 = scalar_lea.sflag [#allocation6], %s221_s15 }
  0x3b   : > { %p1381_p1 = pnand %p797_p13, %p278_p0  ;;  %s1388_s29 = sld [smem:[#allocation4 + %s1647_s17]] }
  0x3c   : > { %p1009_p3 = pneg %p1366_p12  ;;  %s1012_s27 = scalar_lea.hbm %s1576_s2, 128 }
  0x3d   : > { %s1612_s26 = scalar_select %p1381_p1, 1, 0 }
  0x40   : > { %s793_s22 = sshll.u32 %s226_s19, 6 }
  0x41   : > { %s232_s6 = scalar_lea.hbm %s1576_s2, %s793_s22 }
  0x42   : > { %s1007_s20 = scalar_lea.hbm %s232_s6, 64  ;;  %p1013_p0 = scmp.lt.s32.totalorder %s232_s6, %s1576_s2 }
  0x43   : > { %p1008_p2 = scmp.ne.s32.totalorder %s232_s6, %s1007_s20  ;;  %p1014_p8 = scmp.lt.s32.totalorder %s1012_s27, %s1007_s20 }
  0x45   : > { %p1010_p6 = pnand %p1009_p3, %p1008_p2  ;;  %p1015_p7 = por %p1014_p8, %p1013_p0 }
  0x47   : > { %p1011_p13 = pneg %p1010_p6 }
  0x49   : > { %p1016_p5 = pnand %p1015_p7, %p1011_p13 }
  0x4b   : > { %1019 = shalt.err (!%p1016_p5)
}
  0x4c   : > { %s1020_s0 = scalar_lea.vmem %s1385_s11, 64  ;;  %s1201_s9 = smov [#allocation5]  }
  0x4d   : > { %p1021_p10 = scmp.ne.s32.totalorder %s1385_s11, %s1020_s0  ;;  %s1025_s15 = sshll.u32 %s1201_s9, 4  ;;  %s1026_s15 = int_to_ptr.vmem [resolvable:$false] %s1025_s15 }
  0x4e   : > { %s1027_s19 = scalar_lea.vmem %s1026_s15, 128  ;;  %p1028_p6 = scmp.lt.s32.totalorder %s1385_s11, %s1026_s15 }
  0x4f   : > { %p1023_p4 = pnand %p1021_p10, %p1009_p3  ;;  %p1029_p11 = scmp.lt.s32.totalorder %s1027_s19, %s1020_s0 }
  0x51   : > { %p1024_p2 = pneg %p1023_p4  ;;  %p1030_p1 = por %p1029_p11, %p1028_p6 }
  0x53   : > { %p1031_p9 = pnand %p1030_p1, %p1024_p2 }
  0x55   : > { %1034 = shalt.err (!%p1031_p9)
}
  0x56   : > { %869 = dma.hbm_to_vmem [thread:$0]  (!%p1366_p12), %s232_s6, 64, %s1385_s11, %s222_s28  }
  0x57   : > { %p139_p7 = scmp.ne.s32.totalorder %s1169_s7, %s1165_s30  ;;  %s126_s5 = sadd.s32 1, %s1173_s8 }
  0x58   : > { %p1613_p9 = scmp.eq.s32.totalorder %s1197_s14, 0  ;;  %p1614_p11 = scmp.ne.s32.totalorder %s1173_s8, %s1169_s7 }
  0x59   : > { %s119_s17 = ssub.s32 %s1360_s25, %s1388_s29  ;;  %p1615_p5 = scmp.ne.s32.totalorder %s1602_s21, 0 }
  0x5a   : > { %p135_p4 = por %p1614_p11, %p1613_p9  ;;  %p124_p1 = scmp.eq.s32.totalorder %s119_s17, 0 }
  0x5b   : > { %p1421_p8 = por %p139_p7, %p1615_p5  ;;  %s253_s22 = sand.u32 1, %s1173_s8  }
  0x5c   : > { %p1617_p10 = scmp.lt.s32.totalorder %s1197_s14, 2  ;;  %s794_s30 = sshll.u32 %s253_s22, 5 }
  0x5d   : > { %s1616_s18 = scalar_select %p1421_p8, 1, 0 }
  0x5e   : > { %p1428_p3 = pnand %p1617_p10, %p135_p4  ;;  %p1619_p12 = pmov %p1617_p10 }
  0x5f   : > { %s1433_s6 = scalar_select %p124_p1, %s1173_s8, %s126_s5  }
  0x60   : > { %s857_s11 = scalar_select %p135_p4, [#allocation4], [#allocation12] }
  0x61   : > { %s858_s28 = scalar_select %p135_p4, %s1193_s13, 0 }
  0x62   : > { %s1653_s11 = smov (!%p1619_p12, %s857_s11), [#allocation14]  ;;  %p1620_p13 = pmov %p1617_p10 }
  0x63   : > { %s257_s21 = scalar_lea.vmem [#allocation8], %s794_s30  ;;  %s1447_s9 = scalar_lea.sflag [#allocation9], %s253_s22 }
  0x64   : > { %s1655_s28 = smov (!%p1620_p13, %s858_s28), 0  ;;  %s270_s25 = sshll.u32 %s257_s21, 4  ;;  %s1440_s25 = int_to_ptr.vmem [resolvable:$true] %s270_s25 }
  0x65   : > { %s258_s29 = sld [smem:[%s1653_s11 + %s1655_s28]]  ;;  %p1037_p2 = pneg %p1428_p3 }
  0x66   : > { %s1040_s17 = scalar_lea.hbm %s1578_s4, 1024 }
  0x6b   : > { %s821_s23 = sshll.u32 %s258_s29, 9 }
  0x6c   : > { %s1445_s0 = scalar_lea.hbm %s1578_s4, %s821_s23 }
  0x6d   : > { %s1035_s15 = scalar_lea.hbm %s1445_s0, 512  ;;  %p1041_p9 = scmp.lt.s32.totalorder %s1445_s0, %s1578_s4 }
  0x6e   : > { %p1036_p0 = scmp.ne.s32.totalorder %s1445_s0, %s1035_s15  ;;  %p1042_p11 = scmp.lt.s32.totalorder %s1040_s17, %s1035_s15 }
  0x70   : > { %p1038_p6 = pnand %p1037_p2, %p1036_p0  ;;  %p1043_p4 = por %p1042_p11, %p1041_p9 }
  0x72   : > { %p1039_p7 = pneg %p1038_p6 }
  0x74   : > { %p1044_p5 = pnand %p1043_p4, %p1039_p7 }
  0x76   : > { %1047 = shalt.err (!%p1044_p5)
}
  0x77   : > { %s1048_s22 = scalar_lea.vmem %s1440_s25, 512  ;;  %s1202_s28 = smov [#allocation8]  }
  0x78   : > { %p1049_p1 = scmp.ne.s32.totalorder %s1440_s25, %s1048_s22  ;;  %s1053_s29 = sshll.u32 %s1202_s28, 4  ;;  %s1054_s29 = int_to_ptr.vmem [resolvable:$false] %s1053_s29 }
  0x79   : > { %s1055_s21 = scalar_lea.vmem %s1054_s29, 1024  ;;  %p1056_p13 = scmp.lt.s32.totalorder %s1440_s25, %s1054_s29 }
  0x7a   : > { %p1051_p10 = pnand %p1049_p1, %p1037_p2  ;;  %p1057_p0 = scmp.lt.s32.totalorder %s1055_s21, %s1048_s22 }
  0x7c   : > { %p1052_p12 = pneg %p1051_p10  ;;  %p1058_p6 = por %p1057_p0, %p1056_p13 }
  0x7e   : > { %p1059_p8 = pnand %p1058_p6, %p1052_p12 }
  0x80   : > { %1062 = shalt.err (!%p1059_p8)
}
  0x81   : > { %s1203_s23 = smov 64   ;;  %s1204_s16 = smov 4  }
  0x82   : > { %874 = dma.hbm_to_vmem [thread:$0]  (!%p1428_p3), %s1445_s0, 512, %s1440_s25, %s1447_s9, %s1203_s23, %s1203_s23, %s1204_s16  }
  0x83   : > { %p1621_p2 = scmp.ne.s32.totalorder %s1612_s26, 0 }
  0x84   : > { %s284_s27 = sand.u32 (!%p1621_p2), 1, %s1181_s10   ;;  %p1622_p7 = scmp.ne.s32.totalorder (!%p1621_p2), %s1604_s24, 0 }
  0x85   : > { %282 = sbr.rel (%p1621_p2) target bundleno = 370 (0x172), region = 32  ;;  %s798_s15 = sshll.u32 (!%p1621_p2), %s284_s27, 2 }
  0x86   : > { %s285_s19 = scalar_lea.sflag (!%p1621_p2), [#allocation6], %s284_s27  ;;  %s288_s5 = scalar_lea.vmem (!%p1621_p2), [#allocation5], %s798_s15 }
  0x8a   : > { %1140 = dma.done.wait (%p1622_p7), %s285_s19, 64  }
  0x8b   : > { %1142 = vsyncadd (%p1622_p7), %s285_s19, 4294967232  ;;  %s293_s17 = sand.u32 1, %s1169_s7   ;;  %p1623_p8 = scmp.ne.s32.totalorder %s1616_s18, 0 }
  0x8c   : > { %s799_s30 = sshll.u32 %s293_s17, 5  ;;  %s294_s20 = scalar_lea.sflag [#allocation9], %s293_s17 }
  0x8d   : > { %s297_s25 = scalar_lea.vmem [#allocation8], %s799_s30 }
  0x8e   : > { %1144 = dma.done.wait (%p1623_p8), %s294_s20, 512  }
  0x8f   : > { %1146 = vsyncadd (%p1623_p8), %s294_s20, 4294966784  ;;  %v1205_v0 = vmov 0.0   ;;  %s343_s26 = sld [smem:[#allocation4 + %s1189_s12]]  ;;  %vm1206_vm0 = vmmov 0   ;;  %vm372_vm1 = vcmask 261120   ;;  %v983_v1 = vld [vmem:[%s297_s25] sm:$0xff]  }
  0x90   : > { %830 = vmatprep.subr.bf16.mxu0 %v1205_v0  ;;  %836 = vmatprep.subr.bf16.mxu1 %v1205_v0  ;;  %v984_v2 = vld [vmem:[%s297_s25 + $0x8] sm:$0xff]   ;;  %v377_v3 = vsel %vm372_vm1, %v983_v1, 0  ;;  %v363_v4 = vld [vmem:[%s288_s5] sm:$0xf]  ;;  %v985_v7 = vld [vmem:[%s297_s25 + $0x10] sm:$0xff]   ;;  %vm598_vm2 = vcmask 257024  }
  0x91   : > { %832 = vmatprep.mubr.msk.bf16.mxu0 %vm1206_vm0, %v1205_v0  ;;  %838 = vmatprep.mubr.msk.bf16.mxu1 %vm1206_vm0, %v1205_v0  ;;  %v435_v5 = vsel %vm372_vm1, %v984_v2, 0  ;;  %v364_v6 = vpack.c.bf16 %v363_v4, %v363_v4  ;;  %v986_v8 = vld [vmem:[%s297_s25 + $0x18] sm:$0xff]   ;;  %v492_v10 = vsel %vm372_vm1, %v985_v7, 0  ;;  %p355_p9 = scmp.lt.s32.totalorder %s1189_s12, 1  ;;  %s1624_s21 = sld [smem:[#allocation27_spill]]  ;;  %vm602_vm3 = vcmask 3072  }
  0x92   : > { %831 = vmatpush3.bf16.xpose.msra.mxu0 %v377_v3  ;;  %837 = vmatpush3.bf16.xpose.msra.mxu1 %v435_v5  ;;  %v548_v12 = vsel %vm372_vm1, %v986_v8, 0  ;;  %s339_s16 = sand.u32 1, %s1157_s1   ;;  %vm419_vm4 = vcmask 122880   ;;  %s1625_s19 = sld [smem:[#allocation24_spill]] }
  0x93   : > { %842 = vmatprep.subr.bf16.mxu0 %v1205_v0  ;;  %848 = vmatprep.subr.bf16.mxu1 %v1205_v0  ;;  %v424_v9 = vshrl.u32 %v364_v6, 16  ;;  %v482_v16 = vrot.slane %v364_v6, 1  ;;  %s356_s11 = scalar_select %p355_p9, %s1189_s12, 1 }
  0x94   : > { %s800_s27 = sshll.u32 %s339_s16, 2  ;;  %s818_s5 = sshll.u32 %s1189_s12, 6 }
  0x95   : > { %p344_p3 = scmp.lt.s32.totalorder %s343_s26, 1  ;;  %v538_v17 = vrot.slane %v424_v9, 1  ;;  %s802_s22 = sshll.u32 %s356_s11, 2 }
  0x96   : > { %s341_s15 = scalar_lea.vmem [#allocation10], %s800_s27  ;;  %s1626_s25 = sld [smem:[#allocation28_spill]] }
  0x97   : > { %s1657_s26 = smov (!%p344_p3, %s343_s26), 1  ;;  %s361_s23 = scalar_lea.vmem %s1624_s21, %s802_s22 }
  0x98   : > { %s801_s24 = sshll.u32 %s1657_s26, 1  ;;  %s630_s17 = sshll.u32 %s341_s15, 4  ;;  %s1510_s17 = int_to_ptr.vmem [resolvable:$true] %s630_s17 }
  0x99   : > { %s350_s9 = scalar_lea.vmem %s1577_s3, %s801_s24  ;;  %833 = vmatmul.mubr.msk.bf16.vlgmr.msra.gmra.mxu0 %vm372_vm1, %v364_v6  ;;  %839 = vmatmul.mubr.msk.bf16.vlgmr.msra.gmra.mxu1 %vm372_vm1, %v424_v9  ;;  %s612_s12 = scalar_lea.sflag [#allocation7], %s339_s16 }
  0x9a   : > { %v595_v11 = vld [vmem:[%s350_s9] sm:$0x3]  ;;  %843 = vmatpush3.bf16.xpose.msra.mxu0 %v492_v10  ;;  %849 = vmatpush3.bf16.xpose.msra.mxu1 %v548_v12  ;;  %s1063_s24 = scalar_lea.vmem %s1510_s17, 64  ;;  %p1627_p4 = scmp.ne.s32.totalorder %s1625_s19, 0 }
  0x9b   : > { %v596_v13 = vunpack.c.l.bf16 %v595_v11  ;;  %844 = vmatprep.mubr.msk.bf16.mxu0 %vm1206_vm0, %v1205_v0  ;;  %850 = vmatprep.mubr.msk.bf16.mxu1 %vm1206_vm0, %v1205_v0  ;;  %p1064_p11 = scmp.ne.s32.totalorder %s1510_s17, %s1063_s24  ;;  %s1207_s18 = smov [#allocation10]  }
  0x9c   : > { %s1508_s26 = scalar_lea.hbm %s1626_s25, %s818_s5  ;;  %s1067_s0 = sshll.u32 %s1207_s18, 4  ;;  %s1068_s0 = int_to_ptr.vmem [resolvable:$false] %s1067_s0 }
  0x9d   : > { %v597_v14 = vmul.f32 %v596_v13, %v363_v4  ;;  %p1065_p5 = pnand %p1064_p11, %p1627_p4  ;;  %s1069_s9 = scalar_lea.vmem %s1068_s0, 128 }
  0x9e   : > { %p1070_p10 = scmp.lt.s32.totalorder %s1510_s17, %s1068_s0  ;;  %p1071_p12 = scmp.lt.s32.totalorder %s1069_s9, %s1063_s24 }
  0x9f   : > { %v599_v15 = vsel %vm598_vm2, %v597_v14, 0.0  ;;  %p1066_p1 = pneg %p1065_p5 }
  0xa0   : > { %600 = vadd.xlane.f32.xlu0 %v599_v15  ;;  %p1072_p13 = por %p1071_p12, %p1070_p10 }
  0xa1   : > { %845 = vmatmul.mubr.msk.bf16.vlgmr.msra.gmra.mxu0 %vm372_vm1, %v482_v16  ;;  %851 = vmatmul.mubr.msk.bf16.vlgmr.msra.gmra.mxu1 %vm372_vm1, %v538_v17 }
  0xa2   : > { %p1073_p0 = pnand %p1072_p13, %p1066_p1 }
 0x129   : > { %v601_v18 = vpop.xlane.xlu0 %600 }
 0x12a   : > { %603 = vst.msk [vmem:[%s361_s23] sm:$0xf] %vm602_vm3, %v601_v18 }
 0x159   : > { %v413_v19 = vpop.f32.mrf.mxu0  ;;  %v471_v20 = vpop.f32.mrf.mxu1 }
 0x15a   : > { %420 = vst.msk [vmem:[%s341_s15] sm:$0x1] %vm419_vm4, %v413_v19  ;;  %477 = vst.msk [vmem:[%s341_s15 + $0x1] sm:$0x1] %vm419_vm4, %v471_v20 }
 0x15b   : > { %v834_v21 = vpop.f32.mrf.mxu0  ;;  %v840_v22 = vpop.f32.mrf.mxu1 }
 0x15d   : > { %v416_v23 = vpop.f32.mrf.mxu0  ;;  %v474_v24 = vpop.f32.mrf.mxu1 }
 0x15f   : > { %v835_v25 = vpop.f32.mrf.mxu0  ;;  %v841_v26 = vpop.f32.mrf.mxu1 }
 0x161   : > { %v528_v27 = vpop.f32.mrf.mxu0  ;;  %v584_v28 = vpop.f32.mrf.mxu1 }
 0x162   : > { %534 = vst.msk [vmem:[%s341_s15 + $0x2] sm:$0x1] %vm419_vm4, %v528_v27  ;;  %590 = vst.msk [vmem:[%s341_s15 + $0x3] sm:$0x1] %vm419_vm4, %v584_v28 }
 0x163   : > { %v846_v29 = vpop.f32.mrf.mxu0  ;;  %v852_v30 = vpop.f32.mrf.mxu1 }
 0x164   : > { %1076 = shalt.err (!%p1073_p0)
}
 0x165   : > { %s1077_s11 = scalar_lea.hbm %s1508_s26, 64  ;;  %s1081_s29 = scalar_lea.hbm %s1626_s25, 128 }
 0x166   : > { %p1078_p6 = scmp.ne.s32.totalorder %s1508_s26, %s1077_s11  ;;  %p1082_p8 = scmp.lt.s32.totalorder %s1508_s26, %s1626_s25 }
 0x167   : > { %p1083_p3 = scmp.lt.s32.totalorder %s1081_s29, %s1077_s11 }
 0x168   : > { %p1079_p2 = pnand %p1078_p6, %p1627_p4 }
 0x169   : > { %p1084_p9 = por %p1083_p3, %p1082_p8 }
 0x16a   : > { %p1080_p7 = pneg %p1079_p2 }
 0x16c   : > { %p1085_p11 = pnand %p1084_p9, %p1080_p7 }
 0x16e   : > { %1088 = shalt.err (!%p1085_p11)
}
 0x16f   : > { %862 = dma.vmem_to_hbm [thread:$0]  (%p1627_p4), %s1510_s17, 64, %s1508_s26, %s612_s12   ;;  %v531_v31 = vpop.f32.mrf.mxu0  ;;  %v587_v32 = vpop.f32.mrf.mxu1 }
 0x171   : > { %v847_v33 = vpop.f32.mrf.mxu0  ;;  %v853_v34 = vpop.f32.mrf.mxu1 }
 0x172 PF: > { %s1628_s16 = sld [smem:[#allocation19_spill]]  ;;  %p1631_p1 = scmp.ge.s32.totalorder %s1197_s14, 2 }
 0x173   : > { %s1629_s27 = sld [smem:[#allocation25_spill]] }
 0x178   : > { %s652_s15 = sand.u32 1, %s1628_s16  }
 0x179   : > { %p1630_p5 = scmp.ne.s32.totalorder %s1629_s27, 0  ;;  %s653_s5 = scalar_lea.sflag [#allocation7], %s652_s15 }
 0x17b   : > { %p876_p10 = pnand %p1631_p1, %p1630_p5 }
 0x17d   : > { %p877_p12 = pneg %p876_p10 }
 0x17f   : > { %1148 = dma.done.wait (%p877_p12), %s653_s5, 64  }
 0x180   : > { %1150 = vsyncadd (%p877_p12), %s653_s5, 4294967232  ;;  %s34_s14 = sadd.s32 1, %s1197_s14   ;;  %s1632_s19 = sld [smem:[#allocation20_spill]] }
 0x181   : > { %p31_p13 = scmp.ge.s32.totalorder %s34_s14, 4   ;;  %s1633_s29 = sld [smem:[#allocation23_spill]] }
 0x182   : > { %s1634_s17 = sld [smem:[#allocation21_spill]]  ;;  %s1637_s0 = smov %s1157_s1 }
 0x183   : > { %s1635_s11 = sld [smem:[#allocation26_spill]]  ;;  %s1639_s30 = smov %s1169_s7 }
 0x184   : > { %s1636_s20 = sld [smem:[#allocation22_spill]]  ;;  %s1640_s7 = smov %s1173_s8 }
 0x185   : > { %s1641_s8 = smov %s1433_s6  ;;  %s1642_s9 = smov %s1181_s10 }
 0x186   : > { %s1638_s1 = smov %s1632_s19  ;;  %s1644_s12 = smov %s1193_s13 }
 0x187   :  { %33 = sbr.rel (!%p31_p13) target bundleno = 28 (0x1c), region = 112 }
 0x188   : > { %s1643_s10 = smov %s1634_s17 }
 0x18a   : > { %s1645_s13 = smov %s1636_s20 }
 0x18c   :  { %658 = vsyncpa [#allocation6], 1 }
 0x18d   :  { %660 = vsyncpa [#allocation6 + $0x1], 1 }
 0x18e   :  { %661 = vsyncpa [#allocation9], 1 }
 0x18f   :  { %663 = vsyncpa [#allocation9 + $0x1], 1 }
 0x190   :  { %664 = vsyncpa [#allocation7], 1 }
 0x191   :  { %666 = vsyncpa [#allocation7 + $0x1], 1 }

</bundles_post_ra>
